<compile_context>
chip_gen: v7x
topology: tpu7x:2x2x1
jax: 0.10.0
libtpu: 0.0.40
codegen_flags: <defaults>
</compile_context>

<pallas_src>
import functools

import numpy as np
import jax
import jax.numpy as jnp
from jax.experimental import pallas as pl
from jax.experimental.pallas import tpu as pltpu


_NEG = -1e30          # Python float -> folds into the jaxpr as a literal, never a captured const


# ----------------------------------------------------------------------------
# Small helpers
# ----------------------------------------------------------------------------
def _round_up(x, m):
    return (x + m - 1) // m * m


def _vmem_limits():
    """Generation-aware scoped-VMEM limit / tile-chooser budget (bytes)."""
    try:
        cap = int(pltpu.get_tpu_info().vmem_capacity_bytes)
    except Exception:
        cap = 64 * 1024 * 1024                       # conservative (v7x per-TC) fallback
    limit = min(int(cap * 0.8), 100 * 1024 * 1024)
    return limit, (limit * 3) // 4


@functools.lru_cache(maxsize=None)
def _single_buffering_ok():
    """Probe whether pipeline_mode=pl.Buffered(1) lowers on this jax/backend."""
    def k(a_ref, b_ref, o_ref):
        o_ref[...] = a_ref[...] + b_ref[...]

    try:
        a = jnp.ones((16, 128), jnp.float32)
        b = jnp.full((8, 128), 2.0, jnp.float32)
        out = pl.pallas_call(
            k,
            out_shape=jax.ShapeDtypeStruct((16, 128), jnp.float32),
            grid=(2,),
            in_specs=[pl.BlockSpec((8, 128), lambda i: (i, 0)),
                      pl.BlockSpec((8, 128), lambda i: (0, 0),
                                   pipeline_mode=pl.Buffered(1))],
            out_specs=pl.BlockSpec((8, 128), lambda i: (i, 0)),
        )(a, b)
        return bool(jnp.all(jax.block_until_ready(out) == 3.0))
    except Exception:
        return False


def _const_spec(shape, index_map):
    """BlockSpec for a grid-invariant operand; single-buffered when supported."""
    if _single_buffering_ok():
        return pl.BlockSpec(shape, index_map, pipeline_mode=pl.Buffered(1))
    return pl.BlockSpec(shape, index_map)


def _choose_tiles(n, hc, budget):
    """Pick (tm, tk, n_pad): target-row tile, source-chunk tile, padded node count.

    With source-dimension tiling the per-step VMEM footprint is independent of the
    graph size, so even the tm=tk=128 floor always fits the budget.
    """
    n8 = _round_up(n, 8)
    if n8 <= 128:
        return n8, n8, n8                            # single tiny block
    t = 128
    for cand in (256, 512):
        need = (2 * cand * cand                      # adj int8 tile (double buffered)
                + 16 * cand * cand                   # ~4 f32 [tm, tk] softmax temporaries
                + 4 * cand * hc                      # xw source chunk, bf16 (double buffered)
                + 16 * cand * hc                     # acc scratch + xw_next / x outputs
                + 6 * hc * hc)                       # resident next-layer weights
        if need <= budget:
            t = cand
    t = min(t, _round_up(n, 128))                    # don't over-pad small graphs
    n_pad = _round_up(n, t)
    tm, tk = t, t
    if n_pad // tm < 2 and n_pad >= 256:
        tm = t // 2                                  # >=2 row blocks -> both v7x TCs busy
    return tm, tk, n_pad


# ----------------------------------------------------------------------------
# Kernels
# ----------------------------------------------------------------------------
def gat_prepass0_kernel(x_ref, pos_ref, wp_ref, bp_ref, wtop_ref, wbot_ref, att_ref,
                        xw_ref, asrc_t_ref, adst_ref, *, heads):
    """First layer prepass with the positional encoder fused in.

    xw = [x | pos@Wp+bp] @ W  evaluated as x@W_top + pe@W_bot (no in-kernel concat),
    plus the attention-logit terms a_src (pre-transposed) and a_dst.
    """
    pe = (pos_ref[:, 0:1] * wp_ref[0:1, :]
          + pos_ref[:, 1:2] * wp_ref[1:2, :]
          + bp_ref[...])                                              # K=2 on the VPU
    xw = (jnp.dot(x_ref[...].astype(jnp.bfloat16), wtop_ref[...],
                  preferred_element_type=jnp.float32)
          + jnp.dot(pe.astype(jnp.bfloat16), wbot_ref[...],
                    preferred_element_type=jnp.float32))              # [tm, H*C] f32
    xw_ref[...] = xw.astype(jnp.bfloat16)
    a = jnp.dot(xw, att_ref[...], preferred_element_type=jnp.float32)  # [tm, 2H]
    adst_ref[...] = a[:, heads:]
    asrc_t_ref[...] = a[:, :heads].T                                   # small one-off transpose


def _attn_chunk(adst_ref, asrc_t_ref, xw_ref, adj_ref, m_sc, l_sc, acc_sc, *, heads, out_ch):
    """Online-softmax update for one (target-row tile x source chunk) grid step."""
    @pl.when(pl.program_id(1) == 0)
    def _():
        m_sc[...] = jnp.full_like(m_sc, -jnp.inf)
        l_sc[...] = jnp.zeros_like(l_sc)
        acc_sc[...] = jnp.zeros_like(acc_sc)

    mask = adj_ref[...] != 0                                  # int8 -> bool, hoisted once
    tm = adst_ref.shape[0]
    m_cols, l_cols, alpha_cols, pv_cols = [], [], [], []
    for h in range(heads):                                    # static unroll
        c0 = h * out_ch
        e = adst_ref[:, h:h + 1] + asrc_t_ref[h:h + 1, :]     # [tm, tk]
        e = jnp.maximum(e, 0.2 * e)                           # LeakyReLU(0.2)
        e = jnp.where(mask, e, _NEG)                          # select-based masking
        m_prev = m_sc[:, h:h + 1]
        m_new = jnp.maximum(m_prev, jnp.max(e, axis=-1, keepdims=True))
        alpha = jnp.exp(m_prev - m_new)                       # rescale of previous chunks
        p = jnp.exp(e - m_new)                                # unnormalized weights (<= 1)
        l_cols.append(alpha * l_sc[:, h:h + 1] + jnp.sum(p, axis=-1, keepdims=True))
        pv_cols.append(jnp.dot(p.astype(jnp.bfloat16), xw_ref[:, c0:c0 + out_ch],
                               preferred_element_type=jnp.float32))   # [tm, C]
        alpha_cols.append(jnp.broadcast_to(alpha, (tm, out_ch)))
        m_cols.append(m_new)
    # Single lane-dense update of running stats and the accumulator.
    m_sc[...] = jnp.concatenate(m_cols, axis=-1)
    l_sc[...] = jnp.concatenate(l_cols, axis=-1)
    acc_sc[...] = (jnp.concatenate(alpha_cols, axis=-1) * acc_sc[...]
                   + jnp.concatenate(pv_cols, axis=-1))


def _attn_finalize(scale_ref, shift_ref, m_sc, l_sc, acc_sc, *, heads, out_ch):
    """Deferred softmax normalization + fused GATConv-bias/BatchNorm(eval) + ELU."""
    tm = acc_sc.shape[0]
    inv = 1.0 / l_sc[...]                                     # exact divide on tiny [tm, H]
    inv_full = jnp.concatenate(
        [jnp.broadcast_to(inv[:, h:h + 1], (tm, out_ch)) for h in range(heads)], axis=-1)
    y = acc_sc[...] * inv_full * scale_ref[...] + shift_ref[...]
    return jnp.where(y > 0, y, jnp.exp(jnp.minimum(y, 0.0)) - 1.0)     # ELU


def gat_attn_last_kernel(adst_ref, asrc_t_ref, xw_ref, adj_ref, scale_ref, shift_ref,
                         o_ref, m_sc, l_sc, acc_sc, *, heads, out_ch):
    _attn_chunk(adst_ref, asrc_t_ref, xw_ref, adj_ref, m_sc, l_sc, acc_sc,
                heads=heads, out_ch=out_ch)

    @pl.when(pl.program_id(1) == pl.num_programs(1) - 1)
    def _():
        o_ref[...] = _attn_finalize(scale_ref, shift_ref, m_sc, l_sc, acc_sc,
                                    heads=heads, out_ch=out_ch)


def gat_attn_fused_kernel(adst_ref, asrc_t_ref, xw_ref, adj_ref, scale_ref, shift_ref,
                          wn_ref, attn_ref,
                          xwn_ref, asrcn_t_ref, adstn_ref, m_sc, l_sc, acc_sc,
                          *, heads, out_ch):
    """Attention for layer l fused with layer l+1's prepass (x never reaches HBM)."""
    _attn_chunk(adst_ref, asrc_t_ref, xw_ref, adj_ref, m_sc, l_sc, acc_sc,
                heads=heads, out_ch=out_ch)

    @pl.when(pl.program_id(1) == pl.num_programs(1) - 1)
    def _():
        y = _attn_finalize(scale_ref, shift_ref, m_sc, l_sc, acc_sc,
                           heads=heads, out_ch=out_ch)
        xwn = jnp.dot(y.astype(jnp.bfloat16), wn_ref[...],
                      preferred_element_type=jnp.float32)             # next layer x@W
        xwn_ref[...] = xwn.astype(jnp.bfloat16)
        a = jnp.dot(xwn, attn_ref[...], preferred_element_type=jnp.float32)   # [tm, 2H]
        adstn_ref[...] = a[:, heads:]
        asrcn_t_ref[...] = a[:, :heads].T


def pool_fc_kernel(pool_ref, x_ref, wfc_ref, bfc_ref, o_ref, acc_ref):
    """global_mean_pool (as pooling-matrix matmul, K-tiled) + final Linear."""
    k = pl.program_id(0)

    @pl.when(k == 0)
    def _():
        acc_ref[...] = jnp.zeros_like(acc_ref)

    acc_ref[...] += jnp.dot(pool_ref[...], x_ref[...],
                            preferred_element_type=jnp.float32)

    @pl.when(k == pl.num_programs(0) - 1)
    def _():
        o_ref[...] = jnp.dot(acc_ref[...], wfc_ref[...],
                             preferred_element_type=jnp.float32) + bfc_ref[...]


# ----------------------------------------------------------------------------
# pallas_call wrappers
# ----------------------------------------------------------------------------
def gat_prepass0(x, pos, wp, bp, w_top, w_bot, att_cat, *, heads, out_ch, tm, vmem_limit):
    n_pad, f = x.shape
    p = wp.shape[1]
    hc = heads * out_ch
    kern = functools.partial(gat_prepass0_kernel, heads=heads)
    return pl.pallas_call(
        kern,
        out_shape=(
            jax.ShapeDtypeStruct((n_pad, hc), jnp.bfloat16),    # xw (bf16 for AV matmul)
            jax.ShapeDtypeStruct((heads, n_pad), jnp.float32),  # a_src, pre-transposed
            jax.ShapeDtypeStruct((n_pad, heads), jnp.float32),  # a_dst
        ),
        grid=(n_pad // tm,),
        in_specs=[
            pl.BlockSpec((tm, f), lambda i: (i, 0)),
            pl.BlockSpec((tm, 2), lambda i: (i, 0)),
            _const_spec((2, p), lambda i: (0, 0)),
            _const_spec((1, p), lambda i: (0, 0)),
            _const_spec((f, hc), lambda i: (0, 0)),
            _const_spec((p, hc), lambda i: (0, 0)),
            _const_spec((hc, 2 * heads), lambda i: (0, 0)),
        ],
        out_specs=(
            pl.BlockSpec((tm, hc), lambda i: (i, 0)),
            pl.BlockSpec((heads, tm), lambda i: (0, i)),
            pl.BlockSpec((tm, heads), lambda i: (i, 0)),
        ),
        compiler_params=pltpu.CompilerParams(
            dimension_semantics=("parallel",), vmem_limit_bytes=vmem_limit),
    )(x, pos, wp, bp, w_top, w_bot, att_cat)


def gat_attention(a_dst, a_src_t, xw, adj, scale, shift, *, heads, out_ch, tm, tk,
                  vmem_limit, next_w=None, next_att=None):
    n_pad = a_dst.shape[0]
    hc = heads * out_ch
    grid = (n_pad // tm, n_pad // tk)                       # rows parallel, source chunks last
    in_specs = [
        pl.BlockSpec((tm, heads), lambda i, k: (i, 0)),     # a_dst rows of this tile
        pl.BlockSpec((heads, tk), lambda i, k: (0, k)),     # a_src^T source chunk
        pl.BlockSpec((tk, hc), lambda i, k: (k, 0)),        # xw source chunk (bf16)
        pl.BlockSpec((tm, tk), lambda i, k: (i, k)),        # adjacency tile (int8)
        _const_spec((1, hc), lambda i, k: (0, 0)),          # fused BN scale
        _const_spec((1, hc), lambda i, k: (0, 0)),          # fused BN shift (+ bias)
    ]
    scratch = [pltpu.VMEM((tm, heads), jnp.float32),        # running max
               pltpu.VMEM((tm, heads), jnp.float32),        # running row-sum
               pltpu.VMEM((tm, hc), jnp.float32)]           # running AV accumulator
    cparams = pltpu.CompilerParams(dimension_semantics=("parallel", "arbitrary"),
                                   vmem_limit_bytes=vmem_limit)

    if next_w is None:                                      # last layer: emit x for pooling
        kern = functools.partial(gat_attn_last_kernel, heads=heads, out_ch=out_ch)
        return pl.pallas_call(
            kern,
            out_shape=jax.ShapeDtypeStruct((n_pad, hc), jnp.float32),
            grid=grid,
            in_specs=in_specs,
            out_specs=pl.BlockSpec((tm, hc), lambda i, k: (i, 0)),
            scratch_shapes=scratch,
            compiler_params=cparams,
        )(a_dst, a_src_t, xw, adj, scale, shift)

    kern = functools.partial(gat_attn_fused_kernel, heads=heads, out_ch=out_ch)
    return pl.pallas_call(
        kern,
        out_shape=(
            jax.ShapeDtypeStruct((n_pad, hc), jnp.bfloat16),    # next layer xw
            jax.ShapeDtypeStruct((heads, n_pad), jnp.float32),  # next layer a_src^T
            jax.ShapeDtypeStruct((n_pad, heads), jnp.float32),  # next layer a_dst
        ),
        grid=grid,
        in_specs=in_specs + [
            _const_spec((hc, hc), lambda i, k: (0, 0)),         # next layer W (bf16)
            _const_spec((hc, 2 * heads), lambda i, k: (0, 0)),  # next layer att_cat
        ],
        out_specs=(
            pl.BlockSpec((tm, hc), lambda i, k: (i, 0)),
            pl.BlockSpec((heads, tm), lambda i, k: (0, i)),
            pl.BlockSpec((tm, heads), lambda i, k: (i, 0)),
        ),
        scratch_shapes=scratch,
        compiler_params=cparams,
    )(a_dst, a_src_t, xw, adj, scale, shift, next_w, next_att)


def pool_fc(pool_mat, x, wfc, bfc, *, tm, vmem_limit):
    b, n_pad = pool_mat.shape
    hc = x.shape[1]
    o = wfc.shape[1]
    return pl.pallas_call(
        pool_fc_kernel,
        out_shape=jax.ShapeDtypeStruct((b, o), jnp.float32),
        grid=(n_pad // tm,),
        in_specs=[
            pl.BlockSpec((b, tm), lambda k: (0, k)),
            pl.BlockSpec((tm, hc), lambda k: (k, 0)),
            _const_spec((hc, o), lambda k: (0, 0)),
            _const_spec((1, o), lambda k: (0, 0)),
        ],
        out_specs=pl.BlockSpec((b, o), lambda k: (0, 0)),
        scratch_shapes=[pltpu.VMEM((b, hc), jnp.float32)],
        compiler_params=pltpu.CompilerParams(
            dimension_semantics=("arbitrary",), vmem_limit_bytes=vmem_limit),
    )(pool_mat, x, wfc, bfc)


# ----------------------------------------------------------------------------
# Host-side glue (mirrors the PyTorch module)
# ----------------------------------------------------------------------------
def generate_positions(batch):
    """Replicates OptimizedPositionalGAT._generate_positions exactly (host side)."""
    batch = np.asarray(batch)
    n = batch.shape[0]
    pos = np.zeros((n, 2), np.float32)
    uniq, counts = np.unique(batch, return_counts=True)
    start = 0
    for _, cnt in zip(uniq, counts):
        cnt = int(cnt)
        gs = int(np.ceil(np.sqrt(cnt)))
        denom = max(gs - 1, 1)
        for i in range(cnt):
            pos[start + i, 0] = (i // gs) / denom
            pos[start + i, 1] = (i % gs) / denom
        start += cnt
    return pos


def build_adjacency_padded(edge_index, num_nodes, n_pad):
    """int8 adj[target, source] = 1 per edge source->target; self-loops for real nodes."""
    adj = np.zeros((n_pad, n_pad), np.int8)
    src, dst = np.asarray(edge_index)
    adj[dst, src] = 1
    idx = np.arange(num_nodes)
    adj[idx, idx] = 1                       # GATConv add_self_loops=True
    return adj


def build_pool_matrix_padded(batch, num_graphs, n_pad):
    batch = np.asarray(batch)
    pool = np.zeros((num_graphs, n_pad), np.float32)
    for g in range(num_graphs):
        idx = np.where(batch == g)[0]
        pool[g, idx] = 1.0 / len(idx)
    return pool


def build_att_cat(att_src, att_dst, heads, out_ch):
    """[heads*out_ch, 2*heads] block matrix so (x@W) @ att_cat = [a_src | a_dst]."""
    m = np.zeros((heads * out_ch, 2 * heads), np.float32)
    for h in range(heads):
        m[h * out_ch:(h + 1) * out_ch, h] = np.asarray(att_src[h])
        m[h * out_ch:(h + 1) * out_ch, heads + h] = np.asarray(att_dst[h])
    return m


def forward(x_feat, edge_index, batch, params, *, heads, hidden_dim):
    n, f = x_feat.shape
    hc = heads * hidden_dim
    num_graphs = int(np.max(np.asarray(batch))) + 1
    vmem_limit, vmem_budget = _vmem_limits()
    tm, tk, n_pad = _choose_tiles(n, hc, vmem_budget)

    pos = np.zeros((n_pad, 2), np.float32)
    pos[:n] = generate_positions(batch)
    adj = jnp.asarray(build_adjacency_padded(edge_index, n, n_pad))
    pool_mat = jnp.asarray(build_pool_matrix_padded(batch, num_graphs, n_pad))
    x = jnp.pad(jnp.asarray(x_feat, jnp.float32), ((0, n_pad - n), (0, 0)))

    layers = params["layers"]
    # Fold GATConv bias + BatchNorm1d(eval) into one scale/shift per layer (host side).
    scales, shifts = [], []
    for layer in layers:
        s = layer["gamma"] / jnp.sqrt(layer["running_var"] + 1e-5)
        scales.append(s)
        shifts.append(layer["beta"] + (layer["bias"] - layer["running_mean"]) * s)

    # Layer-0 prepass with the positional encoder + concat fused in.
    w0 = layers[0]["w"]
    xw, a_src_t, a_dst = gat_prepass0(
        x, jnp.asarray(pos), params["wp"], params["bp"],
        w0[:f].astype(jnp.bfloat16), w0[f:].astype(jnp.bfloat16), layers[0]["att_cat"],
        heads=heads, out_ch=hidden_dim, tm=tm, vmem_limit=vmem_limit)

    # Attention layers; every mid layer's epilogue produces the next layer's prepass,
    # so intermediate node features never round-trip HBM.
    x_out = None
    for li, layer in enumerate(layers):
        last = li == len(layers) - 1
        if last:
            x_out = gat_attention(a_dst, a_src_t, xw, adj, scales[li], shifts[li],
                                  heads=heads, out_ch=hidden_dim, tm=tm, tk=tk,
                                  vmem_limit=vmem_limit)
        else:
            nxt = layers[li + 1]
            xw, a_src_t, a_dst = gat_attention(
                a_dst, a_src_t, xw, adj, scales[li], shifts[li],
                heads=heads, out_ch=hidden_dim, tm=tm, tk=tk, vmem_limit=vmem_limit,
                next_w=nxt["w"].astype(jnp.bfloat16), next_att=nxt["att_cat"])

    # global_mean_pool + fc (padded node rows have zero pooling weight).
    return pool_fc(pool_mat, x_out, params["wfc"], params["bfc"], tm=tm,
                   vmem_limit=vmem_limit)


def init_params(key, *, input_dim, hidden_dim, output_dim, pos_dim, num_layers, heads):
    keys = jax.random.split(key, 4 + 3 * num_layers)
    ki = iter(keys)

    def rnd(k, shape, scale=0.1):
        return (scale * jax.random.normal(k, shape)).astype(jnp.float32)

    hc = heads * hidden_dim
    params = {
        "wp": rnd(next(ki), (2, pos_dim)),
        "bp": rnd(next(ki), (1, pos_dim)),
        "layers": [],
    }
    in_dim = input_dim + pos_dim
    for _ in range(num_layers):
        w = rnd(next(ki), (in_dim, hc))
        att_src = np.asarray(rnd(next(ki), (heads, hidden_dim)))
        att_dst = np.asarray(rnd(next(ki), (heads, hidden_dim)))
        params["layers"].append({
            "w": w,
            "att_cat": jnp.asarray(build_att_cat(att_src, att_dst, heads, hidden_dim)),
            "bias": jnp.zeros((1, hc), jnp.float32),          # PyG zero-init bias
            "gamma": jnp.ones((1, hc), jnp.float32),          # BN default weight
            "beta": jnp.zeros((1, hc), jnp.float32),          # BN default bias
            "running_mean": jnp.zeros((1, hc), jnp.float32),  # BN eval running stats
            "running_var": jnp.ones((1, hc), jnp.float32),
        })
        in_dim = hc
    params["wfc"] = rnd(next(ki), (hc, output_dim))
    params["bfc"] = rnd(next(ki), (1, output_dim))
    return params


if __name__ == "__main__":
    # Small, deterministic synthetic graph batch.
    input_dim, hidden_dim, output_dim = 16, 32, 8
    pos_dim, num_layers, heads = 16, 2, 4

    # Two graphs: 7 nodes + 9 nodes = 16 nodes total; bidirectional ring edges per graph.
    sizes = [7, 9]
    batch = np.concatenate([np.full(s, g, np.int32) for g, s in enumerate(sizes)])
    num_nodes = int(batch.shape[0])

    src_list, dst_list = [], []
    start = 0
    for s in sizes:
        for i in range(s):
            a = start + i
            b = start + (i + 1) % s
            src_list += [a, b]
            dst_list += [b, a]
        start += s
    edge_index = np.stack([np.array(src_list, np.int32), np.array(dst_list, np.int32)])

    key = jax.random.PRNGKey(0)
    k_x, k_p = jax.random.split(key)
    x_feat = jax.random.normal(k_x, (num_nodes, input_dim), dtype=jnp.float32)

    params = init_params(k_p, input_dim=input_dim, hidden_dim=hidden_dim,
                         output_dim=output_dim, pos_dim=pos_dim,
                         num_layers=num_layers, heads=heads)

    out = forward(x_feat, edge_index, batch, params, heads=heads, hidden_dim=hidden_dim)
    out = jax.block_until_ready(out)

    assert out.shape == (len(sizes), output_dim)
    assert bool(jnp.all(jnp.isfinite(out)))
    print("KERNEL_OK")
</pallas_src>

<mosaic_0001>
module attributes {stable_mosaic.version = 11 : i64} {
  func.func @k(%arg0: i32, %arg1: memref<8x128xf32, #tpu.memory_space<vmem>>, %arg2: memref<8x128xf32, #tpu.memory_space<vmem>>, %arg3: memref<8x128xf32, #tpu.memory_space<vmem>>) attributes {dimension_semantics = [#tpu.dimension_semantics<arbitrary>], iteration_bounds = array<i64: 2>, scalar_prefetch = 0 : i64, scratch_operands = 0 : i64, tpu.core_type = #tpu.core_type<tc>, window_params = [{transform_indices = @transform_0, window_bounds = array<i64: 8, 128>}, {pipeline_mode = #tpu.pipeline_mode<synchronous>, transform_indices = @transform_1, window_bounds = array<i64: 8, 128>}, {transform_indices = @transform_2, window_bounds = array<i64: 8, 128>}]} {
    %c0 = arith.constant 0 : index
    %c0_0 = arith.constant 0 : index
    %0 = vector.load %arg1[%c0, %c0_0] : memref<8x128xf32, #tpu.memory_space<vmem>>, vector<8x128xf32>
    %c0_1 = arith.constant 0 : index
    %c0_2 = arith.constant 0 : index
    %1 = vector.load %arg2[%c0_1, %c0_2] : memref<8x128xf32, #tpu.memory_space<vmem>>, vector<8x128xf32>
    %2 = arith.addf %0, %1 : vector<8x128xf32>
    %c0_3 = arith.constant 0 : index
    %c0_4 = arith.constant 0 : index
    %3 = vector.load %arg3[%c0_3, %c0_4] : memref<8x128xf32, #tpu.memory_space<vmem>>, vector<8x128xf32>
    tpu.vector_store %arg3[%c0_3, %c0_4], %2 {strides = array<i32>} : memref<8x128xf32, #tpu.memory_space<vmem>>, vector<8x128xf32>,
    return
  }
  func.func @transform_0(%arg0: i32) -> (i32, i32) {
    %c0_i32 = arith.constant 0 : i32
    %c0_i32_0 = arith.constant 0 : i32
    return %arg0, %c0_i32 : i32, i32
  }
  func.func @transform_1(%arg0: i32) -> (i32, i32) {
    %c0_i32 = arith.constant 0 : i32
    %c0_i32_0 = arith.constant 0 : i32
    %c0_i32_1 = arith.constant 0 : i32
    return %c0_i32, %c0_i32_0 : i32, i32
  }
  func.func @transform_2(%arg0: i32) -> (i32, i32) {
    %c0_i32 = arith.constant 0 : i32
    %c0_i32_0 = arith.constant 0 : i32
    return %arg0, %c0_i32 : i32, i32
  }
}

module attributes {stable_mosaic.version = 11 : i64} {
  func.func @gat_prepass0_kernel(%arg0: i32, %arg1: memref<16x16xf32, #tpu.memory_space<vmem>>, %arg2: memref<16x2xf32, #tpu.memory_space<vmem>>, %arg3: memref<2x16xf32, #tpu.memory_space<vmem>>, %arg4: memref<1x16xf32, #tpu.memory_space<vmem>>, %arg5: memref<16x128xbf16, #tpu.memory_space<vmem>>, %arg6: memref<16x128xbf16, #tpu.memory_space<vmem>>, %arg7: memref<128x8xf32, #tpu.memory_space<vmem>>, %arg8: memref<16x128xbf16, #tpu.memory_space<vmem>>, %arg9: memref<4x16xf32, #tpu.memory_space<vmem>>, %arg10: memref<16x4xf32, #tpu.memory_space<vmem>>) attributes {dimension_semantics = [#tpu.dimension_semantics<parallel>], iteration_bounds = array<i64: 1>, scalar_prefetch = 0 : i64, scratch_operands = 0 : i64, tpu.core_type = #tpu.core_type<tc>, window_params = [{transform_indices = @transform_0, window_bounds = array<i64: 16, 16>}, {transform_indices = @transform_1, window_bounds = array<i64: 16, 2>}, {pipeline_mode = #tpu.pipeline_mode<synchronous>, transform_indices = @transform_2, window_bounds = array<i64: 2, 16>}, {pipeline_mode = #tpu.pipeline_mode<synchronous>, transform_indices = @transform_3, window_bounds = array<i64: 1, 16>}, {pipeline_mode = #tpu.pipeline_mode<synchronous>, transform_indices = @transform_4, window_bounds = array<i64: 16, 128>}, {pipeline_mode = #tpu.pipeline_mode<synchronous>, transform_indices = @transform_5, window_bounds = array<i64: 16, 128>}, {pipeline_mode = #tpu.pipeline_mode<synchronous>, transform_indices = @transform_6, window_bounds = array<i64: 128, 8>}, {transform_indices = @transform_7, window_bounds = array<i64: 16, 128>}, {transform_indices = @transform_8, window_bounds = array<i64: 4, 16>}, {transform_indices = @transform_9, window_bounds = array<i64: 16, 4>}]} {
    %c0 = arith.constant 0 : index
    %c0_0 = arith.constant 0 : index
    %0 = vector.load %arg2[%c0, %c0_0] : memref<16x2xf32, #tpu.memory_space<vmem>>, vector<16x1xf32>
    %c0_1 = arith.constant 0 : index
    %c0_2 = arith.constant 0 : index
    %1 = vector.load %arg3[%c0_1, %c0_2] : memref<2x16xf32, #tpu.memory_space<vmem>>, vector<1x16xf32>
    %2 = vector.broadcast %0 : vector<16x1xf32> to vector<16x16xf32>
    %3 = vector.broadcast %1 : vector<1x16xf32> to vector<16x16xf32>
    %4 = arith.mulf %2, %3 : vector<16x16xf32>
    %c0_3 = arith.constant 0 : index
    %c1 = arith.constant 1 : index
    %5 = vector.load %arg2[%c0_3, %c1] : memref<16x2xf32, #tpu.memory_space<vmem>>, vector<16x1xf32>
    %c1_4 = arith.constant 1 : index
    %c0_5 = arith.constant 0 : index
    %6 = vector.load %arg3[%c1_4, %c0_5] : memref<2x16xf32, #tpu.memory_space<vmem>>, vector<1x16xf32>
    %7 = vector.broadcast %5 : vector<16x1xf32> to vector<16x16xf32>
    %8 = vector.broadcast %6 : vector<1x16xf32> to vector<16x16xf32>
    %9 = arith.mulf %7, %8 : vector<16x16xf32>
    %10 = arith.addf %4, %9 : vector<16x16xf32>
    %c0_6 = arith.constant 0 : index
    %c0_7 = arith.constant 0 : index
    %11 = vector.load %arg4[%c0_6, %c0_7] : memref<1x16xf32, #tpu.memory_space<vmem>>, vector<1x16xf32>
    %12 = vector.broadcast %11 : vector<1x16xf32> to vector<16x16xf32>
    %13 = arith.addf %10, %12 : vector<16x16xf32>
    %c0_8 = arith.constant 0 : index
    %c0_9 = arith.constant 0 : index
    %14 = vector.load %arg1[%c0_8, %c0_9] : memref<16x16xf32, #tpu.memory_space<vmem>>, vector<16x16xf32>
    %15 = arith.truncf %14 : vector<16x16xf32> to vector<16x16xbf16>
    %c0_10 = arith.constant 0 : index
    %c0_11 = arith.constant 0 : index
    %16 = vector.load %arg5[%c0_10, %c0_11] : memref<16x128xbf16, #tpu.memory_space<vmem>>, vector<16x128xbf16>
    %cst = arith.constant dense<0.000000e+00> : vector<16x128xf32>
    %17 = tpu.matmul %15, %16, %cst {dimension_numbers = #tpu.dot_dimension_numbers<[1], [0], [0], [1], [0, 0, 1, 1], [], []>} : vector<16x16xbf16>, vector<16x128xbf16>, vector<16x128xf32> -> vector<16x128xf32>
    %18 = arith.truncf %13 : vector<16x16xf32> to vector<16x16xbf16>
    %c0_12 = arith.constant 0 : index
    %c0_13 = arith.constant 0 : index
    %19 = vector.load %arg6[%c0_12, %c0_13] : memref<16x128xbf16, #tpu.memory_space<vmem>>, vector<16x128xbf16>
    %cst_14 = arith.constant dense<0.000000e+00> : vector<16x128xf32>
    %20 = tpu.matmul %18, %19, %cst_14 {dimension_numbers = #tpu.dot_dimension_numbers<[1], [0], [0], [1], [0, 0, 1, 1], [], []>} : vector<16x16xbf16>, vector<16x128xbf16>, vector<16x128xf32> -> vector<16x128xf32>
    %21 = arith.addf %17, %20 : vector<16x128xf32>
    %22 = arith.truncf %21 : vector<16x128xf32> to vector<16x128xbf16>
    %c0_15 = arith.constant 0 : index
    %c0_16 = arith.constant 0 : index
    %23 = vector.load %arg8[%c0_15, %c0_16] : memref<16x128xbf16, #tpu.memory_space<vmem>>, vector<16x128xbf16>
    tpu.vector_store %arg8[%c0_15, %c0_16], %22 {strides = array<i32>} : memref<16x128xbf16, #tpu.memory_space<vmem>>, vector<16x128xbf16>,
    %c0_17 = arith.constant 0 : index
    %c0_18 = arith.constant 0 : index
    %24 = vector.load %arg7[%c0_17, %c0_18] : memref<128x8xf32, #tpu.memory_space<vmem>>, vector<128x8xf32>
    %cst_19 = arith.constant dense<0.000000e+00> : vector<16x8xf32>
    %25 = tpu.matmul %21, %24, %cst_19 {dimension_numbers = #tpu.dot_dimension_numbers<[1], [0], [0], [1], [0, 0, 1, 1], [], []>} : vector<16x128xf32>, vector<128x8xf32>, vector<16x8xf32> -> vector<16x8xf32>
    %26 = vector.extract_strided_slice %25 {offsets = [0, 4], sizes = [16, 4], strides = [1, 1]} : vector<16x8xf32> to vector<16x4xf32>
    %c0_20 = arith.constant 0 : index
    %c0_21 = arith.constant 0 : index
    %27 = vector.load %arg10[%c0_20, %c0_21] : memref<16x4xf32, #tpu.memory_space<vmem>>, vector<16x4xf32>
    tpu.vector_store %arg10[%c0_20, %c0_21], %26 {strides = array<i32>} : memref<16x4xf32, #tpu.memory_space<vmem>>, vector<16x4xf32>,
    %28 = vector.extract_strided_slice %25 {offsets = [0, 0], sizes = [16, 4], strides = [1, 1]} : vector<16x8xf32> to vector<16x4xf32>
    %29 = tpu.transpose %28, [1, 0] : vector<16x4xf32> -> vector<4x16xf32>
    %c0_22 = arith.constant 0 : index
    %c0_23 = arith.constant 0 : index
    %30 = vector.load %arg9[%c0_22, %c0_23] : memref<4x16xf32, #tpu.memory_space<vmem>>, vector<4x16xf32>
    tpu.vector_store %arg9[%c0_22, %c0_23], %29 {strides = array<i32>} : memref<4x16xf32, #tpu.memory_space<vmem>>, vector<4x16xf32>,
    return
  }
  func.func @transform_0(%arg0: i32) -> (i32, i32) {
    %c0_i32 = arith.constant 0 : i32
    %c0_i32_0 = arith.constant 0 : i32
    return %arg0, %c0_i32 : i32, i32
  }
  func.func @transform_1(%arg0: i32) -> (i32, i32) {
    %c0_i32 = arith.constant 0 : i32
    %c0_i32_0 = arith.constant 0 : i32
    return %arg0, %c0_i32 : i32, i32
  }
  func.func @transform_2(%arg0: i32) -> (i32, i32) {
    %c0_i32 = arith.constant 0 : i32
    %c0_i32_0 = arith.constant 0 : i32
    %c0_i32_1 = arith.constant 0 : i32
    return %c0_i32, %c0_i32_0 : i32, i32
  }
  func.func @transform_3(%arg0: i32) -> (i32, i32) {
    %c0_i32 = arith.constant 0 : i32
    %c0_i32_0 = arith.constant 0 : i32
    %c0_i32_1 = arith.constant 0 : i32
    return %c0_i32, %c0_i32_0 : i32, i32
  }
  func.func @transform_4(%arg0: i32) -> (i32, i32) {
    %c0_i32 = arith.constant 0 : i32
    %c0_i32_0 = arith.constant 0 : i32
    %c0_i32_1 = arith.constant 0 : i32
    return %c0_i32, %c0_i32_0 : i32, i32
  }
  func.func @transform_5(%arg0: i32) -> (i32, i32) {
    %c0_i32 = arith.constant 0 : i32
    %c0_i32_0 = arith.constant 0 : i32
    %c0_i32_1 = arith.constant 0 : i32
    return %c0_i32, %c0_i32_0 : i32, i32
  }
  func.func @transform_6(%arg0: i32) -> (i32, i32) {
    %c0_i32 = arith.constant 0 : i32
    %c0_i32_0 = arith.constant 0 : i32
    %c0_i32_1 = arith.constant 0 : i32
    return %c0_i32, %c0_i32_0 : i32, i32
  }
  func.func @transform_7(%arg0: i32) -> (i32, i32) {
    %c0_i32 = arith.constant 0 : i32
    %c0_i32_0 = arith.constant 0 : i32
    return %arg0, %c0_i32 : i32, i32
  }
  func.func @transform_8(%arg0: i32) -> (i32, i32) {
    %c0_i32 = arith.constant 0 : i32
    %c0_i32_0 = arith.constant 0 : i32
    return %c0_i32, %arg0 : i32, i32
  }
  func.func @transform_9(%arg0: i32) -> (i32, i32) {
    %c0_i32 = arith.constant 0 : i32
    %c0_i32_0 = arith.constant 0 : i32
    return %arg0, %c0_i32 : i32, i32
  }
}

</mosaic_0001>

<bundles_post_ra>
// kernel: tpu_custom_call.1
= control target key start
LH: loop header
LB: loop body
LE: loop exit
PB: predicated region body
PF: predicated region fallthrough
CT: control target
= control target key end

     0   :  { %7 = vsyncpa [#allocation3], 0  ;;  %s690_s0 = inlined_call_operand.hbm [shape: f32[16,128], index: 0, kind: input, shape index: {}]   ;;  %s691_s1 = inlined_call_operand.hbm [shape: f32[8,128], index: 1, kind: input, shape index: {}]   ;;  %s692_s2 = inlined_call_operand.hbm [shape: f32[16,128], index: 2, kind: output, shape index: {}]  }
   0x1   :  { %9 = vsyncpa [#allocation3 + $0x1], 0 }
   0x2   :  { %10 = vsyncpa [#allocation6], 0 }
   0x3   :  { %11 = vsyncpa [#allocation4], 0 }
   0x4   :  { %13 = vsyncpa [#allocation4 + $0x1], 0  ;;  %s489_s9 = smov 0   ;;  %s491_s10 = smov 0  }
   0x5   :  { %s493_s11 = smov 0   ;;  %s495_s12 = smov 0  }
   0x6 LB: > { %s510_s13 = sadd.s32 4294967295, %s469_s12   ;;  %s270_s14 = sadd.s32 4294967294, %s469_s12   ;;  %s469_s12 = sphi %s495_s12, %s716_s12   ;;  %s465_s11 = sphi %s493_s11, %s715_s11   ;;  %s461_s10 = sphi %s491_s10, %s714_s10   ;;  %s457_s9 = sphi %s489_s9, %s713_s9  }
   0x7   : > { %p39_p0 = scmp.ne.s32.totalorder %s461_s10, %s457_s9  ;;  %p693_p1 = scmp.eq.s32.totalorder %s510_s13, 0 }
   0x8   : > { %p90_p3 = scmp.eq.s32.totalorder %s270_s14, 1  ;;  %p271_p5 = scmp.ge.s32.totalorder %s469_s12, 1 }
   0x9   : > { %p519_p4 = por %p693_p1, %p39_p0  ;;  %p97_p7 = scmp.lt.s32.totalorder %s469_s12, 3 }
   0xa   : > { %p524_p6 = por %p90_p3, %p39_p0  ;;  %s471_s18 = smov [#allocation5]  }
   0xb   : > { %s696_s15 = scalar_select %p519_p4, 1, 0 }
   0xc   : > { %s697_s16 = scalar_select %p524_p6, 1, 0 }
   0xd   : > { %p529_p8 = pnand %p271_p5, %p97_p7  ;;  %s110_s19 = sshll.u32 %s471_s18, 4  ;;  %s111_s19 = int_to_ptr.vmem [resolvable:$true] %s110_s19 }
   0xe   : > { %s537_s20 = sadd.s32 1, %s469_s12   ;;  %s26_s24 = sadd.s32 1, %s465_s11 }
   0xf   : > { %s698_s17 = scalar_select %p529_p8, 1, 0 }
  0x10   : > { %p292_p10 = pneg %p529_p8  ;;  %s23_s22 = ssub.s32 %s469_s12, %s537_s20 }
  0x11   : > { %p547_p12 = scmp.eq.s32.totalorder %s23_s22, 0  ;;  %s341_s27 = scalar_lea.hbm %s691_s1, 128 }
  0x12   : > { %p541_p11 = pnand %p292_p10, %p693_p1  ;;  %p342_p0 = scmp.ne.s32.totalorder %s691_s1, %s341_s27 }
  0x13   : > { %s700_s23 = scalar_select %p547_p12, 1, 0 }
  0x14   : > { %p343_p3 = pneg %p541_p11  ;;  %p348_p10 = scmp.lt.u32.totalorder %s341_s27, %s691_s1 }
  0x16   : > { %p344_p5 = pnand %p343_p3, %p342_p0 }
  0x18   : > { %p345_p7 = pneg %p344_p5 }
  0x1a   : > { %p350_p9 = pnand %p348_p10, %p345_p7 }
  0x1c   : > { %353 = shalt.err (!%p350_p9)
}
  0x1d   : > { %s354_s4 = scalar_lea.vmem %s111_s19, 128  ;;  %p362_p6 = scmp.lt.s32.totalorder %s111_s19, %s111_s19 }
  0x1e   : > { %p355_p1 = scmp.ne.s32.totalorder %s111_s19, %s354_s4  ;;  %p363_p4 = scmp.lt.s32.totalorder %s354_s4, %s354_s4 }
  0x20   : > { %p357_p2 = pnand %p355_p1, %p343_p3  ;;  %p364_p8 = por %p363_p4, %p362_p6 }
  0x22   : > { %p358_p13 = pneg %p357_p2 }
  0x24   : > { %p365_p12 = pnand %p364_p8, %p358_p13 }
  0x26   : > { %368 = shalt.err (!%p365_p12)
}
  0x27   : > { %295 = dma.hbm_to_vmem [thread:$0]  (!%p541_p11), %s691_s1, 128, %s111_s19, [#allocation6]  }
  0x28   : > { %p701_p1 = scmp.ne.s32.totalorder %s700_s23, 0  ;;  %p34_p2 = scmp.eq.s32.totalorder %s469_s12, 0 }
  0x29   : > { %p702_p4 = scmp.ne.s32.totalorder %s465_s11, %s461_s10  ;;  %p703_p6 = scmp.eq.s32.totalorder %s510_s13, 1 }
  0x2a   : > { %s573_s7 = scalar_select %p701_p1, %s465_s11, %s26_s24  }
  0x2b   : > { %p581_p8 = por %p703_p6, %p702_p4  ;;  %p305_p9 = scmp.lt.s32.totalorder %s469_s12, 2 }
  0x2c   : > { %s121_s14 = sand.u32 1, %s465_s11   ;;  %p705_p12 = pmov %p702_p4 }
  0x2d   : > { %s274_s18 = sshll.u32 %s121_s14, 3  ;;  %s275_s21 = sshll.u32 %s469_s12, 7 }
  0x2e   : > { %p35_p13 = por %p34_p2, %p705_p12  ;;  %s594_s19 = scalar_lea.hbm %s690_s0, %s275_s21 }
  0x2f   : > { %s125_s23 = scalar_lea.vmem [#allocation2], %s274_s18  ;;  %s122_s27 = scalar_lea.sflag [#allocation3], %s121_s14 }
  0x30   : > { %s132_s24 = sshll.u32 %s125_s23, 4  ;;  %p596_p11 = pnand %p305_p9, %p35_p13  ;;  %s600_s24 = int_to_ptr.vmem [resolvable:$true] %s132_s24 }
  0x31   : > { %s369_s28 = scalar_lea.hbm %s594_s19, 128  ;;  %s374_s3 = scalar_lea.hbm %s690_s0, 256 }
  0x32   : > { %p370_p0 = scmp.ne.s32.totalorder %s594_s19, %s369_s28  ;;  %p371_p3 = pneg %p596_p11 }
  0x33   : > { %p375_p10 = scmp.lt.u32.totalorder %s594_s19, %s690_s0  ;;  %p376_p1 = scmp.lt.u32.totalorder %s374_s3, %s369_s28 }
  0x34   : > { %p372_p5 = pnand %p371_p3, %p370_p0  ;;  %p378_p4 = scmp.lt.u32.totalorder %s369_s28, %s594_s19 }
  0x35   : > { %p377_p2 = por %p376_p1, %p375_p10 }
  0x36   : > { %p373_p7 = pneg %p372_p5 }
  0x37   : > { %p379_p6 = por %p378_p4, %p377_p2 }
  0x39   : > { %p380_p9 = pnand %p379_p6, %p373_p7 }
  0x3b   : > { %383 = shalt.err (!%p380_p9)
}
  0x3c   : > { %s384_s6 = scalar_lea.vmem %s600_s24, 128  ;;  %s472_s14 = smov [#allocation2]  }
  0x3d   : > { %p385_p12 = scmp.ne.s32.totalorder %s600_s24, %s384_s6  ;;  %s389_s18 = sshll.u32 %s472_s14, 4  ;;  %s390_s18 = int_to_ptr.vmem [resolvable:$false] %s389_s18 }
  0x3e   : > { %s391_s21 = scalar_lea.vmem %s390_s18, 256  ;;  %p392_p5 = scmp.lt.s32.totalorder %s600_s24, %s390_s18 }
  0x3f   : > { %p387_p13 = pnand %p385_p12, %p371_p3  ;;  %p393_p10 = scmp.lt.s32.totalorder %s391_s21, %s384_s6 }
  0x41   : > { %p388_p0 = pneg %p387_p13  ;;  %p394_p1 = por %p393_p10, %p392_p5 }
  0x43   : > { %p395_p2 = pnand %p394_p1, %p388_p0 }
  0x45   : > { %398 = shalt.err (!%p395_p2)
}
  0x46   : > { %299 = dma.hbm_to_vmem [thread:$0]  (!%p596_p11), %s594_s19, 128, %s600_s24, %s122_s27  }
  0x47   : > { %p707_p7 = scmp.ne.s32.totalorder %s698_s17, 0 }
  0x48   : > { %s630_s22 = sand.u32 (!%p707_p7), 1, %s461_s10   ;;  %p708_p3 = scmp.ne.s32.totalorder (!%p707_p7), %s696_s15, 0 }
  0x49   : > { %141 = sbr.rel (%p707_p7) target bundleno = 109 (0x6d), region = 28  ;;  %s277_s25 = sshll.u32 (!%p707_p7), %s630_s22, 3 }
  0x4a   : > { %s144_s23 = scalar_lea.sflag (!%p707_p7), [#allocation3], %s630_s22  ;;  %s147_s28 = scalar_lea.vmem (!%p707_p7), [#allocation2], %s277_s25 }
  0x50   : > { %444 = dma.done.wait (%p708_p3), %s144_s23, 128  }
  0x51   : > { %446 = vsyncadd (%p708_p3), %s144_s23, 4294967168  ;;  %p709_p4 = scmp.eq.s32.totalorder %s510_s13, 0 }
  0x53   : > { %448 = dma.done.wait (%p709_p4), [#allocation6], 128   ;;  %p710_p11 = pmov %p709_p4 }
  0x54   : > { %s171_s17 = scalar_lea.vmem [#allocation7], %s277_s25  ;;  %s281_s24 = sshll.u32 %s510_s13, 7  ;;  %v172_v0 = vld [vmem:[%s147_s28] sm:$0xff]  ;;  %v173_v1 = vld [vmem:[#allocation5] sm:$0xff] }
  0x55   : > { %450 = vsyncadd (%p710_p11), [#allocation6], 4294967168  ;;  %s190_s19 = sshll.u32 %s171_s17, 4  ;;  %v174_v2 = vadd.f32 %v173_v1, %v172_v0  ;;  %s648_s27 = scalar_lea.hbm %s692_s2, %s281_s24  ;;  %s643_s19 = int_to_ptr.vmem [resolvable:$true] %s190_s19 }
  0x56   : > { %s177_s29 = scalar_lea.sflag [#allocation4], %s630_s22  ;;  %s399_s30 = scalar_lea.vmem %s643_s19, 128 }
  0x57   : > { %175 = vst [vmem:[%s171_s17] sm:$0xff] %v174_v2  ;;  %p400_p6 = scmp.ne.s32.totalorder %s643_s19, %s399_s30  ;;  %s473_s13 = smov [#allocation7]  }
  0x58   : > { %s403_s3 = sshll.u32 %s473_s13, 4  ;;  %s404_s3 = int_to_ptr.vmem [resolvable:$false] %s403_s3 }
  0x59   : > { %p401_p9 = pnand %p400_p6, %p581_p8  ;;  %s405_s4 = scalar_lea.vmem %s404_s3, 256 }
  0x5a   : > { %p406_p13 = scmp.lt.s32.totalorder %s643_s19, %s404_s3  ;;  %p407_p0 = scmp.lt.s32.totalorder %s405_s4, %s399_s30 }
  0x5b   : > { %p402_p12 = pneg %p401_p9 }
  0x5c   : > { %p408_p5 = por %p407_p0, %p406_p13 }
  0x5e   : > { %p409_p10 = pnand %p408_p5, %p402_p12 }
  0x60   : > { %412 = shalt.err (!%p409_p10)
}
  0x61   : > { %s413_s5 = scalar_lea.hbm %s648_s27, 128  ;;  %s417_s18 = scalar_lea.hbm %s692_s2, 256 }
  0x62   : > { %p414_p1 = scmp.ne.s32.totalorder %s648_s27, %s413_s5  ;;  %p418_p3 = scmp.lt.u32.totalorder %s648_s27, %s692_s2 }
  0x63   : > { %p419_p4 = scmp.lt.u32.totalorder %s417_s18, %s413_s5  ;;  %p421_p6 = scmp.lt.u32.totalorder %s413_s5, %s648_s27 }
  0x64   : > { %p415_p2 = pnand %p414_p1, %p581_p8 }
  0x65   : > { %p420_p11 = por %p419_p4, %p418_p3 }
  0x66   : > { %p416_p7 = pneg %p415_p2 }
  0x67   : > { %p422_p9 = por %p421_p6, %p420_p11 }
  0x69   : > { %p423_p12 = pnand %p422_p9, %p416_p7 }
  0x6b   : > { %426 = shalt.err (!%p423_p12)
}
  0x6c   : > { %290 = dma.vmem_to_hbm [thread:$0]  (%p581_p8), %s643_s19, 128, %s648_s27, %s177_s29  }
  0x6d PF: > { %s202_s25 = sand.u32 1, %s457_s9   ;;  %p711_p13 = scmp.ne.s32.totalorder %s697_s16, 0 }
  0x6e   : > { %p712_p0 = scmp.ge.s32.totalorder %s469_s12, 2  ;;  %s203_s23 = scalar_lea.sflag [#allocation4], %s202_s25 }
  0x70   : > { %p301_p5 = pnand %p712_p0, %p711_p13 }
  0x72   : > { %452 = dma.done.wait (!%p301_p5), %s203_s23, 128  }
  0x73   : > { %454 = vsyncadd (!%p301_p5), %s203_s23, 4294967168  ;;  %p16_p10 = scmp.ge.s32.totalorder %s537_s20, 4   ;;  %s713_s9 = smov %s461_s10 }
  0x74   : > { %s714_s10 = smov %s465_s11  ;;  %s715_s11 = smov %s573_s7 }
  0x75   : > { %s716_s12 = smov %s537_s20  ;;  %18 = sbr.rel (!%p16_p10) target bundleno = 6 (0x6), region = 77 }
  0x7c   :  { %208 = vsyncpa [#allocation3], 1 }
  0x7d   :  { %210 = vsyncpa [#allocation3 + $0x1], 1 }
  0x7e   :  { %211 = vsyncpa [#allocation6], 1 }
  0x7f   :  { %212 = vsyncpa [#allocation4], 1 }
  0x80   :  { %214 = vsyncpa [#allocation4 + $0x1], 1 }

// kernel: tpu_custom_call.1
= control target key start
LH: loop header
LB: loop body
LE: loop exit
PB: predicated region body
PF: predicated region fallthrough
CT: control target
= control target key end

     0   :  { %15 = vsyncpa [#allocation3], 0  ;;  %v549_v1 = vmov 1   ;;  %v550_v2 = vmov 0   ;;  %s721_s0 = inlined_call_operand.vmem [shape: f32[16,16], index: 0, kind: input, shape index: {}]   ;;  %s722_s1 = inlined_call_operand.vmem [shape: f32[16,2], index: 1, kind: input, shape index: {}]   ;;  %s723_s2 = inlined_call_operand.vmem [shape: f32[2,16], index: 2, kind: input, shape index: {}]   ;;  %s724_s3 = inlined_call_operand.vmem [shape: f32[1,16], index: 3, kind: input, shape index: {}]   ;;  %s725_s4 = inlined_call_operand.vmem [shape: bf16[16,128], index: 4, kind: input, shape index: {}]   ;;  %s726_s5 = inlined_call_operand.vmem [shape: bf16[16,128], index: 5, kind: input, shape index: {}]   ;;  %s727_s6 = inlined_call_operand.vmem [shape: f32[128,8], index: 6, kind: input, shape index: {}]   ;;  %s728_s7 = inlined_call_operand.hbm [shape: bf16[16,128], index: 7, kind: output, shape index: {0}]   ;;  %s729_s8 = inlined_call_operand.hbm [shape: f32[4,16], index: 8, kind: output, shape index: {1}]   ;;  %s730_s9 = inlined_call_operand.vmem [shape: f32[16,4], index: 9, kind: output, shape index: {2}]  }
   0x1   :  { %v32_v0 = vld [vmem:[%s722_s1] sm:$0xff]  ;;  %497 = vset.pattern.permute.xlu1 %v549_v1  ;;  %496 = vset.pattern.permute.xlu0 %v550_v2  ;;  %v33_v3 = vld [vmem:[%s722_s1 + $0x8] sm:$0xff] }
   0x2   :  { %53 = vperm.xlu1 %497, %v32_v0   ;;  %37 = vperm.xlu0 %496, %v32_v0  }
   0x3   :  { %16 = vsyncpa [#allocation5], 0  ;;  %v499_v4 = vld [vmem:[%s726_s5] sm:$0xff]   ;;  %v551_v5 = vmov 0.0   ;;  %vm552_vm0 = vmmov 0   ;;  %v197_v7 = vld [vmem:[%s727_s6 + $0x8] sm:$0xff] }
   0x4   :  { %404 = vmatprep.subr.bf16.mxu0 %v551_v5  ;;  %406 = vmatprep.mubr.msk.bf16.mxu0 %vm552_vm0, %v551_v5  ;;  %v196_v6 = vld [vmem:[%s727_s6] sm:$0xff]  ;;  %v198_v8 = vld [vmem:[%s727_s6 + $0x10] sm:$0xff]  ;;  %v199_v10 = vld [vmem:[%s727_s6 + $0x18] sm:$0xff]  ;;  %vm91_vm1 = vcmask 130048   ;;  %s554_s10 = smov [#allocation2]  }
   0x5   :  { %405 = vmatpush3.bf16.msra.mxu0 %v499_v4  ;;  %v451_v9 = vpack.c.bf16 %v197_v7, %v196_v6  ;;  %v455_v11 = vpack.c.bf16 %v199_v10, %v198_v8  ;;  %v200_v12 = vld [vmem:[%s727_s6 + $0x20] sm:$0xff]  ;;  %v201_v13 = vld [vmem:[%s727_s6 + $0x28] sm:$0xff]  ;;  %v202_v15 = vld [vmem:[%s727_s6 + $0x30] sm:$0xff]  ;;  %s337_s11 = sshll.u32 %s554_s10, 4  ;;  %s338_s11 = int_to_ptr.vmem [resolvable:$true] %s337_s11 }
   0x6   :  { %57 = vperm.xlu1 %497, %v33_v3   ;;  %42 = vperm.xlu0 %496, %v33_v3   ;;  %v459_v14 = vpack.c.bf16 %v201_v13, %v200_v12  ;;  %v203_v16 = vld [vmem:[%s727_s6 + $0x38] sm:$0xff]  ;;  %v204_v18 = vld [vmem:[%s727_s6 + $0x40] sm:$0xff]  ;;  %v205_v19 = vld [vmem:[%s727_s6 + $0x48] sm:$0xff]  ;;  %p506_p1 = scmp.lt.s32.totalorder %s338_s11, %s338_s11 }
   0x7   :  { %410 = vmatprep.subr.bf16.mxu0 %v551_v5  ;;  %452 = vmatprep.subr.bf16.mxu1 %v451_v9  ;;  %v463_v17 = vpack.c.bf16 %v203_v16, %v202_v15  ;;  %v467_v20 = vpack.c.bf16 %v205_v19, %v204_v18  ;;  %v206_v21 = vld [vmem:[%s727_s6 + $0x50] sm:$0xff]  ;;  %v207_v22 = vld [vmem:[%s727_s6 + $0x58] sm:$0xff]  ;;  %v208_v24 = vld [vmem:[%s727_s6 + $0x60] sm:$0xff] }
   0x8   :  { %454 = vmatpush3.bf16.msra.mxu1 %v451_v9  ;;  %v471_v23 = vpack.c.bf16 %v207_v22, %v206_v21  ;;  %v209_v25 = vld [vmem:[%s727_s6 + $0x68] sm:$0xff]  ;;  %v210_v27 = vld [vmem:[%s727_s6 + $0x70] sm:$0xff]  ;;  %v211_v28 = vld [vmem:[%s727_s6 + $0x78] sm:$0xff] }
   0x9   :  { %456 = vmatprep.subr.bf16.mxu1 %v455_v11  ;;  %v475_v26 = vpack.c.bf16 %v209_v25, %v208_v24  ;;  %v479_v29 = vpack.c.bf16 %v211_v28, %v210_v27  ;;  %v367_v30 = vld [vmem:[%s723_s2 + $0x1] ss:$0 sm:$0xff]  ;;  %v366_v31 = vld [vmem:[%s723_s2] ss:$0 sm:$0xff]  ;;  %v78_v48 = vld [vmem:[%s721_s0 + $0x8] sm:$0xff] }
   0xa   :  { %v368_v41 = vld [vmem:[%s724_s3] ss:$0 sm:$0xff] }
   0xb   :  { %v500_v45 = vld [vmem:[%s725_s4] sm:$0xff]   ;;  %s553_s4 = smov 124  }
   0xc   :  { %458 = vmatpush3.bf16.msra.mxu1 %v455_v11  ;;  %v77_v47 = vld [vmem:[%s721_s0] sm:$0xff]  ;;  %s501_s0 = scalar_lea.vmem %s338_s11, 128 }
   0xd   :  { %460 = vmatprep.subr.bf16.mxu1 %v459_v14  ;;  %v79_v49 = vpack.c.bf16 %v78_v48, %v77_v47  ;;  %p502_p0 = scmp.ne.s32.totalorder %s338_s11, %s501_s0  ;;  %p507_p2 = scmp.lt.s32.totalorder %s501_s0, %s501_s0 }
   0xf   :  { %p508_p3 = por %p507_p2, %p506_p1 }
  0x10   :  { %462 = vmatpush3.bf16.msra.mxu1 %v459_v14 }
  0x11   :  { %464 = vmatprep.subr.bf16.mxu1 %v463_v17  ;;  %p509_p4 = pnand %p508_p3, %p502_p0 }
  0x14   :  { %466 = vmatpush3.bf16.msra.mxu1 %v463_v17 }
  0x15   :  { %468 = vmatprep.subr.bf16.mxu1 %v467_v20 }
  0x18   :  { %470 = vmatpush3.bf16.msra.mxu1 %v467_v20 }
  0x19   :  { %472 = vmatprep.subr.bf16.mxu1 %v471_v23 }
  0x1c   :  { %474 = vmatpush3.bf16.msra.mxu1 %v471_v23 }
  0x1d   :  { %476 = vmatprep.subr.bf16.mxu1 %v475_v26 }
  0x20   :  { %478 = vmatpush3.bf16.msra.mxu1 %v475_v26 }
  0x21   :  { %480 = vmatprep.subr.bf16.mxu1 %v479_v29 }
  0x24   :  { %482 = vmatpush3.bf16.msra.mxu1 %v479_v29 }
  0x81   :  { %v54_v32 = vpop.permute.xlu1 %53  ;;  %v38_v33 = vpop.permute.xlu0 %37 }
  0x82   :  { %v64_v34 = vmul.f32 %v367_v30, %v54_v32  ;;  %v49_v35 = vmul.f32 %v366_v31, %v38_v33 }
  0x84   :  { %v66_v38 = vadd.f32 %v64_v34, %v49_v35 }
  0x85   :  { %v58_v36 = vpop.permute.xlu1 %57  ;;  %v43_v37 = vpop.permute.xlu0 %42 }
  0x86   :  { %v65_v39 = vmul.f32 %v367_v30, %v58_v36  ;;  %v50_v40 = vmul.f32 %v366_v31, %v43_v37  ;;  %v75_v43 = vadd.f32 %v368_v41, %v66_v38 }
  0x88   :  { %v67_v42 = vadd.f32 %v65_v39, %v50_v40 }
  0x8a   :  { %v76_v44 = vadd.f32 %v368_v41, %v67_v42 }
  0x8c   :  { %v82_v46 = vpack.c.bf16 %v76_v44, %v75_v43 }
  0x8e   :  { %407 = vmatmul.mubr.msk.bf16.vlgmr.msra.gmra.mrb[0].mxu0 %vm91_vm1, %v82_v46 }
  0x8f   :  { %411 = vmatpush3.bf16.msra.mxu0 %v500_v45  ;;  %412 = vmatprep.mubr.msk.bf16.mxu0 %vm552_vm0, %v551_v5 }
  0x9a   :  { %413 = vmatmul.mubr.msk.bf16.vlgmr.msra.gmra.mrb[0].mxu0 %vm91_vm1, %v79_v49 }
 0x16d   :  { %v179_v50 = vpop.f32.mrb[0].mxu0 }
 0x16e   :  { %v414_v51 = vpop.f32.mrb[1].mxu0  ;;  %448 = vmatprep.mubr.f32.mxu1 %v179_v50 }
 0x16f   :  { %v182_v52 = vpop.f32.mrb[2].mxu0 }
 0x170   :  { %v380_v53 = vpack.c.bf16 %v182_v52, %v179_v50  ;;  %v415_v54 = vpop.f32.mrb[3].mxu0  ;;  %449 = vmatmul.mubr.f32.vlgmr.msra.gmra.mrb[0].mxu1 %v182_v52 }
 0x172   :  { %381 = vst [vmem:[#allocation2] sm:$0xff] %v380_v53  }
 0x243   :  { %v450_v55 = vpop.f32.mrb[0].mxu1 }
 0x244   :  { %291 = vrot.lane.b32.xlu1 %v450_v55, %s553_s4  ;;  %v278_v56 = vpop.f32.mrb[1].mxu1 }
 0x245   :  { %289 = vrot.lane.b32.xlu0 %v278_v56, %s553_s4 }
 0x263   :  { %298 = vxpose.xlu0.b32.start [1/2] (short) (narrow) %v278_v56, 8 }
 0x264   :  { %512 = shalt.err (!%p509_p4)
}
 0x265   :  { %s513_s14 = scalar_lea.hbm %s728_s7, 128 }
 0x266   :  { %p514_p5 = scmp.ne.s32.totalorder %s728_s7, %s513_s14  ;;  %p517_p6 = scmp.lt.u32.totalorder %s513_s14, %s728_s7 }
 0x268   :  { %p519_p7 = pnand %p517_p6, %p514_p5 }
 0x26a   :  { %522 = shalt.err (!%p519_p7)
}
 0x26b   :  { %s555_s18 = smov 64   ;;  %s556_s5 = smov 4   ;;  %299 = vxpose.xlu0.b32.end [2/2] (short) (narrow) %v450_v55, 8  ;;  %vm295_vm2 = vcmask 31744   ;;  %vm330_vm3 = vcmask 125952  }
 0x26c   :  { %343 = dma.vmem_to_hbm [thread:$0]  %s338_s11, 128, %s728_s7, [#allocation3], %s555_s18, %s555_s18, %s556_s5  }
 0x26d   :  { %s557_s25 = smov [#allocation4]  }
 0x26e   :  { %s350_s6 = sshll.u32 %s557_s25, 4  ;;  %s351_s6 = int_to_ptr.vmem [resolvable:$true] %s350_s6 }
 0x26f   :  { %s523_s7 = scalar_lea.vmem %s351_s6, 64  ;;  %p528_p9 = scmp.lt.s32.totalorder %s351_s6, %s351_s6 }
 0x270   :  { %p524_p8 = scmp.ne.s32.totalorder %s351_s6, %s523_s7  ;;  %p529_p10 = scmp.lt.s32.totalorder %s523_s7, %s523_s7 }
 0x272   :  { %p530_p11 = por %p529_p10, %p528_p9 }
 0x274   :  { %p531_p12 = pnand %p530_p11, %p524_p8 }
 0x294   :  { %498 = vset.pattern.permute.xlu0 %v549_v1 }
 0x2b6   :  { %v292_v57 = vpop.permute.xlu1 %291 }
 0x2b7   :  { %297 = vst.msk [vmem:[%s730_s9 + $0x8] sm:$0xff] %vm295_vm2, %v292_v57  ;;  %v290_v58 = vpop.permute.xlu0 %289 }
 0x2b8   :  { %296 = vst.msk [vmem:[%s730_s9] sm:$0xff] %vm295_vm2, %v290_v58 }
 0x2e7   :  { %v314_v59 = vpop.trf.xlu0 }
 0x2e8   :  { %331 = vst.msk [vmem:[#allocation4] sm:$0xf] %vm330_vm3, %v314_v59 }
 0x2e9   :  { %534 = shalt.err (!%p531_p12)
}
 0x2ea   :  { %s535_s28 = scalar_lea.hbm %s729_s8, 64 }
 0x2eb   :  { %p536_p13 = scmp.ne.s32.totalorder %s729_s8, %s535_s28  ;;  %p539_p0 = scmp.lt.u32.totalorder %s535_s28, %s729_s8 }
 0x2ed   :  { %p541_p1 = pnand %p539_p0, %p536_p13 }
 0x2ef   :  { %544 = shalt.err (!%p541_p1)
}
 0x2f0   :  { %353 = dma.vmem_to_hbm [thread:$0]  %s351_s6, 64, %s729_s8, [#allocation5]  }
 0x2f1   :  { %545 = dma.done.wait [#allocation3], 128  }
 0x2f2   :  { %546 = vsyncadd [#allocation3], 4294967168 }
 0x2f3   :  { %547 = dma.done.wait [#allocation5], 64  }
 0x2f4   :  { %548 = vsyncadd [#allocation5], 4294967232 }
 0x2f5   :  { %364 = vsyncpa [#allocation3], 1 }
 0x2f6   :  { %365 = vsyncpa [#allocation5], 1 }

</bundles_post_ra>
